<compile_context>
chip_gen: v6e
topology: v6e:2x2x1
jax: 0.10.0
libtpu: 0.0.40
codegen_flags: <defaults>
</compile_context>

<pallas_src>
import functools
import math

import jax
import jax.numpy as jnp
from jax.experimental import pallas as pl
from jax.experimental.pallas import tpu as pltpu


_LN_EPS = 1e-5

_M_PREFS = (512, 256, 128, 64, 32, 16, 8)   # sublane axis: multiples of 8
_N_PREFS = (256, 128)                       # lane axis: multiples of 128
_K_PREFS = (1024, 512, 256, 128)


@functools.lru_cache(maxsize=None)
def _vmem_limit_bytes():
    """Generation-aware scoped-VMEM limit (v5e/v6e: 128 MiB, v7x: 64 MiB)."""
    cap = 128 * 1024 * 1024
    try:
        info = pltpu.get_tpu_info()
        cap = int(getattr(info, "vmem_capacity_bytes", cap) or cap)
    except Exception:
        pass
    # Leave ~25% headroom for compiler scratch / semaphores.
    return min(int(cap * 3 // 4), 100 * 1024 * 1024)


def _divisor_prefs(dim, prefs):
    hits = [p for p in prefs if dim % p == 0]
    return hits if hits else [dim]


def _pick_tile(dim, prefs):
    return _divisor_prefs(dim, prefs)[0]


# ----------------------------------------------------------------------------
# Tiled linear  (x @ w + b),  w stored bf16, f32 accumulation
# ----------------------------------------------------------------------------

def _linear_kernel(x_ref, w_ref, b_ref, o_ref, acc_ref):
    kk = pl.program_id(2)

    @pl.when(kk == 0)
    def _():
        acc_ref[...] = jnp.zeros_like(acc_ref)

    acc_ref[...] += jnp.dot(x_ref[...].astype(jnp.bfloat16), w_ref[...],
                            preferred_element_type=jnp.float32)

    @pl.when(kk == pl.num_programs(2) - 1)
    def _():
        o_ref[...] = (acc_ref[...] + b_ref[...]).astype(o_ref.dtype)


def _linear_tiles(M, K, N, budget):
    tms = _divisor_prefs(M, _M_PREFS)
    tns = _divisor_prefs(N, _N_PREFS)
    tks = _divisor_prefs(K, _K_PREFS)
    pick = (tms[-1], tns[-1], tks[-1])
    for tm in tms:
        for tk in tks:
            for tn in tns:
                need = 2 * (tm * tk * 4 + tk * tn * 2 + tn * 4 + tm * tn * 4) \
                    + tm * tn * 4
                if need <= budget:
                    return tm, tn, tk
    return pick


def linear(x2d, w, b):
    M, K = x2d.shape
    _, N = w.shape
    vlim = _vmem_limit_bytes()
    tm, tn, tk = _linear_tiles(M, K, N, int(vlim * 0.9))
    return pl.pallas_call(
        _linear_kernel,
        out_shape=jax.ShapeDtypeStruct((M, N), x2d.dtype),
        grid_spec=pltpu.PrefetchScalarGridSpec(
            num_scalar_prefetch=0,
            grid=(M // tm, N // tn, K // tk),
            in_specs=[
                pl.BlockSpec((tm, tk), lambda i, j, kk: (i, kk)),
                pl.BlockSpec((tk, tn), lambda i, j, kk: (kk, j)),
                pl.BlockSpec((1, tn), lambda i, j, kk: (0, j)),
            ],
            out_specs=pl.BlockSpec((tm, tn), lambda i, j, kk: (i, j)),
            scratch_shapes=[pltpu.VMEM((tm, tn), jnp.float32)],
        ),
        compiler_params=pltpu.CompilerParams(
            dimension_semantics=("parallel", "parallel", "arbitrary"),
            vmem_limit_bytes=vlim),
    )(x2d, w, b.reshape(1, N))


# ----------------------------------------------------------------------------
# Dual-output linear: one activation read -> (x@wa+ba, x@wb+bb)
# Used for fc_gk|fc_gv (and fc_k|fc_v when keys is values). No HBM weight
# concat, no output slicing copies.
# ----------------------------------------------------------------------------

def _dual_linear_kernel(x_ref, wa_ref, ba_ref, wb_ref, bb_ref,
                        oa_ref, ob_ref, acca_ref, accb_ref):
    kk = pl.program_id(1)

    @pl.when(kk == 0)
    def _():
        acca_ref[...] = jnp.zeros_like(acca_ref)
        accb_ref[...] = jnp.zeros_like(accb_ref)

    xb = x_ref[...].astype(jnp.bfloat16)
    acca_ref[...] += jnp.dot(xb, wa_ref[...], preferred_element_type=jnp.float32)
    accb_ref[...] += jnp.dot(xb, wb_ref[...], preferred_element_type=jnp.float32)

    @pl.when(kk == pl.num_programs(1) - 1)
    def _():
        oa_ref[...] = (acca_ref[...] + ba_ref[...]).astype(oa_ref.dtype)
        ob_ref[...] = (accb_ref[...] + bb_ref[...]).astype(ob_ref.dtype)


def dual_linear(x2d, wa, ba, wb, bb):
    M, K = x2d.shape
    Na = wa.shape[1]
    Nb = wb.shape[1]
    vlim = _vmem_limit_bytes()
    budget = int(vlim * 0.9)

    tms = _divisor_prefs(M, _M_PREFS)
    tks = _divisor_prefs(K, _K_PREFS)
    tm, tk = tms[-1], tks[-1]
    for cm in tms:
        found = False
        for ck in tks:
            need = 2 * (cm * ck * 4 + ck * Na * 2 + Na * 4 + ck * Nb * 2
                        + Nb * 4 + cm * Na * 4 + cm * Nb * 4) \
                + cm * (Na + Nb) * 4
            if need <= budget:
                tm, tk, found = cm, ck, True
                break
        if found:
            break

    return pl.pallas_call(
        _dual_linear_kernel,
        out_shape=(jax.ShapeDtypeStruct((M, Na), x2d.dtype),
                   jax.ShapeDtypeStruct((M, Nb), x2d.dtype)),
        grid_spec=pltpu.PrefetchScalarGridSpec(
            num_scalar_prefetch=0,
            grid=(M // tm, K // tk),
            in_specs=[
                pl.BlockSpec((tm, tk), lambda i, kk: (i, kk)),
                pl.BlockSpec((tk, Na), lambda i, kk: (kk, 0)),
                pl.BlockSpec((1, Na), lambda i, kk: (0, 0)),
                pl.BlockSpec((tk, Nb), lambda i, kk: (kk, 0)),
                pl.BlockSpec((1, Nb), lambda i, kk: (0, 0)),
            ],
            out_specs=(pl.BlockSpec((tm, Na), lambda i, kk: (i, 0)),
                       pl.BlockSpec((tm, Nb), lambda i, kk: (i, 0))),
            scratch_shapes=[pltpu.VMEM((tm, Na), jnp.float32),
                            pltpu.VMEM((tm, Nb), jnp.float32)],
        ),
        compiler_params=pltpu.CompilerParams(
            dimension_semantics=("parallel", "arbitrary"),
            vmem_limit_bytes=vlim),
    )(x2d, wa, ba.reshape(1, Na), wb, bb.reshape(1, Nb))


# ----------------------------------------------------------------------------
# Projection fused with residual-add + LayerNorm   (fc_o -> +queries -> LN1)
# ----------------------------------------------------------------------------

def _proj_res_ln_kernel(x_ref, w_ref, b_ref, r_ref, ln_g_ref, ln_b_ref,
                        o_ref, acc_ref):
    kk = pl.program_id(1)

    @pl.when(kk == 0)
    def _():
        acc_ref[...] = jnp.zeros_like(acc_ref)

    acc_ref[...] += jnp.dot(x_ref[...].astype(jnp.bfloat16), w_ref[...],
                            preferred_element_type=jnp.float32)

    @pl.when(kk == pl.num_programs(1) - 1)
    def _():
        y = acc_ref[...] + b_ref[...] + r_ref[...].astype(jnp.float32)
        mu = jnp.mean(y, axis=-1, keepdims=True)
        var = jnp.mean((y - mu) ** 2, axis=-1, keepdims=True)
        norm = (y - mu) * jax.lax.rsqrt(var + _LN_EPS)
        o_ref[...] = (norm * ln_g_ref[...] + ln_b_ref[...]).astype(o_ref.dtype)


def proj_residual_layernorm(x2d, w, b, res2d, gamma, beta):
    M, K = x2d.shape
    _, N = w.shape                       # N == d_model; kept whole (LN row)
    vlim = _vmem_limit_bytes()
    budget = int(vlim * 0.9)

    tms = _divisor_prefs(M, _M_PREFS)
    tks = _divisor_prefs(K, _K_PREFS)
    tm, tk = tms[-1], tks[-1]
    for cm in tms:
        found = False
        for ck in tks:
            need = 2 * (cm * ck * 4 + ck * N * 2 + N * 4 + cm * N * 4
                        + N * 4 + N * 4 + cm * N * 4) + cm * N * 4
            if need <= budget:
                tm, tk, found = cm, ck, True
                break
        if found:
            break

    return pl.pallas_call(
        _proj_res_ln_kernel,
        out_shape=jax.ShapeDtypeStruct((M, N), x2d.dtype),
        grid_spec=pltpu.PrefetchScalarGridSpec(
            num_scalar_prefetch=0,
            grid=(M // tm, K // tk),
            in_specs=[
                pl.BlockSpec((tm, tk), lambda i, kk: (i, kk)),
                pl.BlockSpec((tk, N), lambda i, kk: (kk, 0)),
                pl.BlockSpec((1, N), lambda i, kk: (0, 0)),
                pl.BlockSpec((tm, N), lambda i, kk: (i, 0)),
                pl.BlockSpec((1, N), lambda i, kk: (0, 0)),
                pl.BlockSpec((1, N), lambda i, kk: (0, 0)),
            ],
            out_specs=pl.BlockSpec((tm, N), lambda i, kk: (i, 0)),
            scratch_shapes=[pltpu.VMEM((tm, N), jnp.float32)],
        ),
        compiler_params=pltpu.CompilerParams(
            dimension_semantics=("parallel", "arbitrary"),
            vmem_limit_bytes=vlim),
    )(x2d, w, b.reshape(1, N), res2d, gamma.reshape(1, N), beta.reshape(1, N))


# ----------------------------------------------------------------------------
# Fused FFN:  LN( x + relu(x@w1+b1) @ w2 + b2 )   -- no HBM d_ff intermediate
# ----------------------------------------------------------------------------

def _ffn_res_ln_kernel(x_ref, w1_ref, b1_ref, w2_ref, b2_ref,
                       ln_g_ref, ln_b_ref, o_ref, acc_ref):
    f = pl.program_id(1)

    @pl.when(f == 0)
    def _():
        acc_ref[...] = jnp.zeros_like(acc_ref)

    hidden = jnp.dot(x_ref[...].astype(jnp.bfloat16), w1_ref[...],
                     preferred_element_type=jnp.float32)
    hidden = jnp.maximum(hidden + b1_ref[...], 0.0)
    # Explicit, intentional bf16 cast of the ReLU activations for the MXU;
    # accumulation stays f32 in acc_ref.
    acc_ref[...] += jnp.dot(hidden.astype(jnp.bfloat16), w2_ref[...],
                            preferred_element_type=jnp.float32)

    @pl.when(f == pl.num_programs(1) - 1)
    def _():
        y = acc_ref[...] + b2_ref[...] + x_ref[...].astype(jnp.float32)
        mu = jnp.mean(y, axis=-1, keepdims=True)
        var = jnp.mean((y - mu) ** 2, axis=-1, keepdims=True)
        norm = (y - mu) * jax.lax.rsqrt(var + _LN_EPS)
        o_ref[...] = (norm * ln_g_ref[...] + ln_b_ref[...]).astype(o_ref.dtype)


def ffn_residual_layernorm(x2d, w1, b1, w2, b2, gamma, beta):
    M, D = x2d.shape
    d_ff = w1.shape[1]
    vlim = _vmem_limit_bytes()
    budget = int(vlim * 0.9)

    tms = _divisor_prefs(M, _M_PREFS)
    tfs = _divisor_prefs(d_ff, _K_PREFS)
    tm, tf = tms[-1], tfs[-1]
    for cm in tms:
        found = False
        for cf in tfs:
            need = 2 * (cm * D * 4 + D * cf * 2 + cf * 4 + cf * D * 2
                        + D * 4 * 3 + cm * D * 4) + cm * D * 4
            if need <= budget:
                tm, tf, found = cm, cf, True
                break
        if found:
            break

    return pl.pallas_call(
        _ffn_res_ln_kernel,
        out_shape=jax.ShapeDtypeStruct((M, D), x2d.dtype),
        grid_spec=pltpu.PrefetchScalarGridSpec(
            num_scalar_prefetch=0,
            grid=(M // tm, d_ff // tf),
            in_specs=[
                pl.BlockSpec((tm, D), lambda i, f: (i, 0)),
                pl.BlockSpec((D, tf), lambda i, f: (0, f)),
                pl.BlockSpec((1, tf), lambda i, f: (0, f)),
                pl.BlockSpec((tf, D), lambda i, f: (f, 0)),
                pl.BlockSpec((1, D), lambda i, f: (0, 0)),
                pl.BlockSpec((1, D), lambda i, f: (0, 0)),
                pl.BlockSpec((1, D), lambda i, f: (0, 0)),
            ],
            out_specs=pl.BlockSpec((tm, D), lambda i, f: (i, 0)),
            scratch_shapes=[pltpu.VMEM((tm, D), jnp.float32)],
        ),
        compiler_params=pltpu.CompilerParams(
            dimension_semantics=("parallel", "arbitrary"),
            vmem_limit_bytes=vlim),
    )(x2d, w1, b1.reshape(1, d_ff), w2, b2.reshape(1, D),
      gamma.reshape(1, D), beta.reshape(1, D))


# ----------------------------------------------------------------------------
# Memory-augmented attention core: head-batched MXU, lane-dense output store
# ----------------------------------------------------------------------------

def _mem_attention_kernel(q_ref, k_ref, v_ref, gk_ref, gv_ref, o_ref,
                          *, h, d_k, d_v):
    # q: (1, tq, h, d_k), k: (1, nk, h, d_k), v: (1, nk, h, d_v),
    # gk: (1, ng, h, d_k), gv: (1, ng, h, d_v); out: (1, tq, h*d_v)
    scale = 1.0 / math.sqrt(d_k)
    q = q_ref[0].astype(jnp.bfloat16)       # (tq, h, d_k)
    k = k_ref[0].astype(jnp.bfloat16)       # (nk, h, d_k)
    gk = gk_ref[0].astype(jnp.bfloat16)     # (ng, h, d_k)
    v = v_ref[0].astype(jnp.bfloat16)       # (nk, h, d_v)
    gv = gv_ref[0].astype(jnp.bfloat16)     # (ng, h, d_v)

    # Head-batched scores (h as dot_general batch dim).
    s_k = jnp.einsum('qhd,khd->hqk', q, k,
                     preferred_element_type=jnp.float32) * scale   # (h, tq, nk)
    s_g = jnp.einsum('qhd,ghd->hqg', q, gk,
                     preferred_element_type=jnp.float32) * scale   # (h, tq, ng)

    # Joint softmax over [keys, grid] without a physical concat.
    m = jnp.maximum(jnp.max(s_k, axis=-1, keepdims=True),
                    jnp.max(s_g, axis=-1, keepdims=True))
    p_k = jnp.exp(s_k - m)
    p_g = jnp.exp(s_g - m)
    denom = (jnp.sum(p_k, axis=-1, keepdims=True)
             + jnp.sum(p_g, axis=-1, keepdims=True))                # (h, tq, 1)

    out = (jnp.einsum('hqk,khd->hqd', p_k.astype(jnp.bfloat16), v,
                      preferred_element_type=jnp.float32)
           + jnp.einsum('hqg,ghd->hqd', p_g.astype(jnp.bfloat16), gv,
                        preferred_element_type=jnp.float32))
    out = out / denom                                               # (h, tq, d_v)

    # Single lane-dense store of all heads.
    o_ref[0] = jnp.concatenate([out[i] for i in range(h)],
                               axis=-1).astype(o_ref.dtype)


def memory_attention(q4, k4, v4, gk4, gv4, h, d_k, d_v):
    b, nq = q4.shape[0], q4.shape[1]
    nk = k4.shape[1]
    ng = gk4.shape[1]
    tq = _pick_tile(nq, (512, 256, 128))   # falls back to nq for small seqs
    vlim = _vmem_limit_bytes()
    kern = functools.partial(_mem_attention_kernel, h=h, d_k=d_k, d_v=d_v)
    return pl.pallas_call(
        kern,
        out_shape=jax.ShapeDtypeStruct((b, nq, h * d_v), q4.dtype),
        grid=(b, nq // tq),
        in_specs=[
            pl.BlockSpec((1, tq, h, d_k), lambda i, qi: (i, qi, 0, 0)),
            pl.BlockSpec((1, nk, h, d_k), lambda i, qi: (i, 0, 0, 0)),
            pl.BlockSpec((1, nk, h, d_v), lambda i, qi: (i, 0, 0, 0)),
            pl.BlockSpec((1, ng, h, d_k), lambda i, qi: (i, 0, 0, 0)),
            pl.BlockSpec((1, ng, h, d_v), lambda i, qi: (i, 0, 0, 0)),
        ],
        out_specs=pl.BlockSpec((1, tq, h * d_v), lambda i, qi: (i, qi, 0)),
        compiler_params=pltpu.CompilerParams(
            dimension_semantics=("parallel", "parallel"),
            vmem_limit_bytes=vlim),
    )(q4, k4, v4, gk4, gv4)


# ----------------------------------------------------------------------------
# Parameters (deterministic synthetic init, matching init_weights)
# ----------------------------------------------------------------------------

def _xavier(key, d_in, d_out):
    limit = math.sqrt(6.0 / (d_in + d_out))
    return jax.random.uniform(key, (d_in, d_out), jnp.float32, -limit, limit)


def init_params(key, d_model, d_k, d_v, h, d_ff):
    ks = jax.random.split(key, 8)
    bf = jnp.bfloat16
    p = dict(d_model=d_model, d_k=d_k, d_v=d_v, h=h, d_ff=d_ff)
    # Weights pre-cast to bf16 once (MXU-native); biases / LN params stay f32.
    p["wq"], p["bq"] = _xavier(ks[0], d_model, h * d_k).astype(bf), jnp.zeros((h * d_k,), jnp.float32)
    p["wk"], p["bk"] = _xavier(ks[1], d_model, h * d_k).astype(bf), jnp.zeros((h * d_k,), jnp.float32)
    p["wgk"], p["bgk"] = _xavier(ks[2], d_model, h * d_k).astype(bf), jnp.zeros((h * d_k,), jnp.float32)
    p["wv"], p["bv"] = _xavier(ks[3], d_model, h * d_v).astype(bf), jnp.zeros((h * d_v,), jnp.float32)
    p["wgv"], p["bgv"] = _xavier(ks[4], d_model, h * d_v).astype(bf), jnp.zeros((h * d_v,), jnp.float32)
    p["wo"], p["bo"] = _xavier(ks[5], h * d_v, d_model).astype(bf), jnp.zeros((d_model,), jnp.float32)
    p["ln1_g"], p["ln1_b"] = jnp.ones((d_model,), jnp.float32), jnp.zeros((d_model,), jnp.float32)
    p["w1"], p["b1"] = _xavier(ks[6], d_model, d_ff).astype(bf), jnp.zeros((d_ff,), jnp.float32)
    p["w2"], p["b2"] = _xavier(ks[7], d_ff, d_model).astype(bf), jnp.zeros((d_model,), jnp.float32)
    p["ln2_g"], p["ln2_b"] = jnp.ones((d_model,), jnp.float32), jnp.zeros((d_model,), jnp.float32)
    return p


# ----------------------------------------------------------------------------
# EncoderLayer forward
# ----------------------------------------------------------------------------

def encoder_layer_forward(params, queries, keys, values, key_grid):
    b, nq, d_model = queries.shape
    nk = keys.shape[1]
    h, d_k, d_v = params["h"], params["d_k"], params["d_v"]

    if key_grid.ndim == 2:                       # (b, d_model) -> (b, 1, d_model)
        key_grid = key_grid[:, None, :]
    ng = key_grid.shape[1]

    # ----- ScaledDotProductAttentionMemory: projections -----
    q = linear(queries.reshape(b * nq, d_model), params["wq"], params["bq"]
               ).reshape(b, nq, h, d_k)

    if keys is values:
        # fc_k | fc_v fused: the activation tensor is read from HBM once.
        k2, v2 = dual_linear(keys.reshape(b * nk, d_model),
                             params["wk"], params["bk"],
                             params["wv"], params["bv"])
    else:
        k2 = linear(keys.reshape(b * nk, d_model), params["wk"], params["bk"])
        v2 = linear(values.reshape(b * nk, d_model), params["wv"], params["bv"])
    k = k2.reshape(b, nk, h, d_k)
    v = v2.reshape(b, nk, h, d_v)

    # fc_gk | fc_gv fused: key_grid read once, two outputs, no weight concat.
    gk2, gv2 = dual_linear(key_grid.reshape(b * ng, d_model),
                           params["wgk"], params["bgk"],
                           params["wgv"], params["bgv"])
    gk = gk2.reshape(b, ng, h, d_k)
    gv = gv2.reshape(b, ng, h, d_v)

    # ----- attention core: head-batched, lane-dense output -----
    att = memory_attention(q, k, v, gk, gv, h, d_k, d_v)    # (b, nq, h*d_v)

    # ----- fc_o + residual(queries) + LayerNorm1 (dropout = identity) -----
    mh = proj_residual_layernorm(
        att.reshape(b * nq, h * d_v), params["wo"], params["bo"],
        queries.reshape(b * nq, d_model), params["ln1_g"], params["ln1_b"])

    # ----- PositionWiseFeedForward + residual + LayerNorm2, fully fused -----
    out = ffn_residual_layernorm(
        mh, params["w1"], params["b1"], params["w2"], params["b2"],
        params["ln2_g"], params["ln2_b"])
    return out.reshape(b, nq, d_model)


# ----------------------------------------------------------------------------
# Main
# ----------------------------------------------------------------------------

if __name__ == "__main__":
    # Small shapes consistent with the module's forward signature.
    b, nq, nk = 2, 8, 8
    d_model, d_k, d_v, h, d_ff = 32, 16, 16, 2, 64

    root = jax.random.PRNGKey(0)
    k_param, k_q, k_k, k_g = jax.random.split(root, 4)

    params = init_params(k_param, d_model, d_k, d_v, h, d_ff)

    queries = jax.random.normal(k_q, (b, nq, d_model), jnp.float32)
    keys = jax.random.normal(k_k, (b, nk, d_model), jnp.float32)
    values = keys            # encoder-style (keys is values) -> fused k|v path
    key_grid = jax.random.normal(k_g, (b, d_model), jnp.float32)  # 2-D path

    out = encoder_layer_forward(params, queries, keys, values, key_grid)
    out = jax.block_until_ready(out)

    assert out.shape == (b, nq, d_model), out.shape
    assert bool(jnp.all(jnp.isfinite(out)))
    print("KERNEL_OK")
</pallas_src>

<mosaic_0001>
module attributes {stable_mosaic.version = 11 : i64} {
  func.func @_linear_kernel(%arg0: i32, %arg1: i32, %arg2: i32, %arg3: memref<16x32xf32, #tpu.memory_space<vmem>>, %arg4: memref<32x32xbf16, #tpu.memory_space<vmem>>, %arg5: memref<1x32xf32, #tpu.memory_space<vmem>>, %arg6: memref<16x32xf32, #tpu.memory_space<vmem>>, %arg7: memref<16x32xf32, #tpu.memory_space<vmem>>) attributes {dimension_semantics = [#tpu.dimension_semantics<parallel>, #tpu.dimension_semantics<parallel>, #tpu.dimension_semantics<arbitrary>], iteration_bounds = array<i64: 1, 1, 1>, scalar_prefetch = 0 : i64, scratch_operands = 1 : i64, tpu.core_type = #tpu.core_type<tc>, window_params = [{transform_indices = @transform_0, window_bounds = array<i64: 16, 32>}, {transform_indices = @transform_1, window_bounds = array<i64: 32, 32>}, {transform_indices = @transform_2, window_bounds = array<i64: 1, 32>}, {transform_indices = @transform_3, window_bounds = array<i64: 16, 32>}]} {
    %c0_i32 = arith.constant 0 : i32
    %0 = arith.cmpi eq, %arg2, %c0_i32 : i32
    %1 = arith.extui %0 : i1 to i32
    %c0_i32_0 = arith.constant 0 : i32
    %2 = arith.cmpi ne, %1, %c0_i32_0 : i32
    scf.if %2 {
      %cst_10 = arith.constant 0.000000e+00 : f32
      %13 = vector.broadcast %cst_10 : f32 to vector<16x32xf32>
      %c0_11 = arith.constant 0 : index
      %c0_12 = arith.constant 0 : index
      %14 = vector.load %arg7[%c0_11, %c0_12] : memref<16x32xf32, #tpu.memory_space<vmem>>, vector<16x32xf32>
      tpu.vector_store %arg7[%c0_11, %c0_12], %13 {strides = array<i32>} : memref<16x32xf32, #tpu.memory_space<vmem>>, vector<16x32xf32>,
    } else {
    }
    %c0 = arith.constant 0 : index
    %c0_1 = arith.constant 0 : index
    %3 = vector.load %arg7[%c0, %c0_1] : memref<16x32xf32, #tpu.memory_space<vmem>>, vector<16x32xf32>
    %c0_2 = arith.constant 0 : index
    %c0_3 = arith.constant 0 : index
    %4 = vector.load %arg3[%c0_2, %c0_3] : memref<16x32xf32, #tpu.memory_space<vmem>>, vector<16x32xf32>
    %5 = arith.truncf %4 : vector<16x32xf32> to vector<16x32xbf16>
    %c0_4 = arith.constant 0 : index
    %c0_5 = arith.constant 0 : index
    %6 = vector.load %arg4[%c0_4, %c0_5] : memref<32x32xbf16, #tpu.memory_space<vmem>>, vector<32x32xbf16>
    %cst = arith.constant dense<0.000000e+00> : vector<16x32xf32>
    %7 = tpu.matmul %5, %6, %cst {dimension_numbers = #tpu.dot_dimension_numbers<[1], [0], [0], [1], [0, 0, 1, 1], [], []>} : vector<16x32xbf16>, vector<32x32xbf16>, vector<16x32xf32> -> vector<16x32xf32>
    %8 = arith.addf %3, %7 : vector<16x32xf32>
    %c0_6 = arith.constant 0 : index
    %c0_7 = arith.constant 0 : index
    %9 = vector.load %arg7[%c0_6, %c0_7] : memref<16x32xf32, #tpu.memory_space<vmem>>, vector<16x32xf32>
    tpu.vector_store %arg7[%c0_6, %c0_7], %8 {strides = array<i32>} : memref<16x32xf32, #tpu.memory_space<vmem>>, vector<16x32xf32>,
    %c0_i32_8 = arith.constant 0 : i32
    %10 = arith.cmpi eq, %arg2, %c0_i32_8 : i32
    %11 = arith.extui %10 : i1 to i32
    %c0_i32_9 = arith.constant 0 : i32
    %12 = arith.cmpi ne, %11, %c0_i32_9 : i32
    scf.if %12 {
      %c0_10 = arith.constant 0 : index
      %c0_11 = arith.constant 0 : index
      %13 = vector.load %arg7[%c0_10, %c0_11] : memref<16x32xf32, #tpu.memory_space<vmem>>, vector<16x32xf32>
      %c0_12 = arith.constant 0 : index
      %c0_13 = arith.constant 0 : index
      %14 = vector.load %arg5[%c0_12, %c0_13] : memref<1x32xf32, #tpu.memory_space<vmem>>, vector<1x32xf32>
      %15 = vector.broadcast %14 : vector<1x32xf32> to vector<16x32xf32>
      %16 = arith.addf %13, %15 : vector<16x32xf32>
      %c0_14 = arith.constant 0 : index
      %c0_15 = arith.constant 0 : index
      %17 = vector.load %arg6[%c0_14, %c0_15] : memref<16x32xf32, #tpu.memory_space<vmem>>, vector<16x32xf32>
      tpu.vector_store %arg6[%c0_14, %c0_15], %16 {strides = array<i32>} : memref<16x32xf32, #tpu.memory_space<vmem>>, vector<16x32xf32>,
    } else {
    }
    return
  }
  func.func @transform_0(%arg0: i32, %arg1: i32, %arg2: i32) -> (i32, i32) {
    %c0_i32 = arith.constant 0 : i32
    return %arg0, %arg2 : i32, i32
  }
  func.func @transform_1(%arg0: i32, %arg1: i32, %arg2: i32) -> (i32, i32) {
    %c0_i32 = arith.constant 0 : i32
    return %arg2, %arg1 : i32, i32
  }
  func.func @transform_2(%arg0: i32, %arg1: i32, %arg2: i32) -> (i32, i32) {
    %c0_i32 = arith.constant 0 : i32
    %c0_i32_0 = arith.constant 0 : i32
    return %c0_i32, %arg1 : i32, i32
  }
  func.func @transform_3(%arg0: i32, %arg1: i32, %arg2: i32) -> (i32, i32) {
    %c0_i32 = arith.constant 0 : i32
    return %arg0, %arg1 : i32, i32
  }
}

</mosaic_0001>

<bundles_post_ra>
// kernel: tpu_custom_call.1
= control target key start
LH: loop header
LB: loop body
LE: loop exit
PB: predicated region body
PF: predicated region fallthrough
CT: control target
= control target key end

     0   :  { %8 = vsyncpa [#allocation4], 0  ;;  %s301_s0 = inlined_call_operand.hbm [shape: f32[16,32], index: 0, kind: input, shape index: {}]   ;;  %s302_s1 = inlined_call_operand.hbm [shape: bf16[32,32], index: 1, kind: input, shape index: {}]   ;;  %s303_s2 = inlined_call_operand.vmem [shape: f32[1,32], index: 2, kind: input, shape index: {}]   ;;  %s304_s3 = inlined_call_operand.hbm [shape: f32[16,32], index: 3, kind: output, shape index: {}]  }
   0x1   :  { %9 = vsyncpa [#allocation7], 0 }
   0x2   :  { %10 = vsyncpa [#allocation5], 0  ;;  %s247_s12 = smov [#allocation3]  }
   0x3   :  { %s16_s13 = sshll.u32 %s247_s12, 4  ;;  %s17_s13 = int_to_ptr.vmem [resolvable:$true] %s16_s13 }
   0x4   :  { %s189_s14 = scalar_lea.vmem %s17_s13, 256  ;;  %p194_p1 = scmp.lt.s32.totalorder %s17_s13, %s17_s13 }
   0x5   :  { %p190_p0 = scmp.ne.s32.totalorder %s17_s13, %s189_s14  ;;  %p195_p2 = scmp.lt.s32.totalorder %s189_s14, %s189_s14 }
   0x7   :  { %p196_p3 = por %p195_p2, %p194_p1 }
   0x9   :  { %p197_p4 = pnand %p196_p3, %p190_p0 }
   0xb   :  { %200 = shalt.err (!%p197_p4)
}
   0xc   :  { %s248_s15 = smov 128   ;;  %s249_s16 = smov 8  }
   0xd   :  { %22 = dma.hbm_to_vmem [thread:$0]  %s301_s0, 256, %s17_s13, [#allocation4], %s248_s15, %s248_s15, %s249_s16  }
   0xe   :  { %s250_s19 = smov [#allocation6]  }
   0xf   :  { %s28_s20 = sshll.u32 %s250_s19, 4  ;;  %s29_s20 = int_to_ptr.vmem [resolvable:$true] %s28_s20 }
  0x10   :  { %s209_s21 = scalar_lea.vmem %s29_s20, 256  ;;  %p214_p6 = scmp.lt.s32.totalorder %s29_s20, %s29_s20 }
  0x11   :  { %p210_p5 = scmp.ne.s32.totalorder %s29_s20, %s209_s21  ;;  %p215_p7 = scmp.lt.s32.totalorder %s209_s21, %s209_s21 }
  0x13   :  { %p216_p8 = por %p215_p7, %p214_p6 }
  0x15   :  { %p217_p9 = pnand %p216_p8, %p210_p5 }
  0x17   :  { %220 = shalt.err (!%p217_p9)
}
  0x18   :  { %s251_s22 = smov 64   ;;  %s252_s23 = smov 4  }
  0x19   :  { %34 = dma.hbm_to_vmem [thread:$0]  %s302_s1, 256, %s29_s20, [#allocation7], %s251_s22, %s251_s22, %s252_s23  }
  0x1a   :  { %241 = dma.done.wait [#allocation4], 256  }
  0x1b   :  { %242 = vsyncadd [#allocation4], 4294967040 }
  0x1c   :  { %243 = dma.done.wait [#allocation7], 256  }
  0x1d   :  { %244 = vsyncadd [#allocation7], 4294967040  ;;  %vm48_vm0 = vcmask 261120   ;;  %v253_v0 = vmov 0.0   ;;  %vm254_vm1 = vmmov 0   ;;  %v179_v1 = vld [vmem:[#allocation6 + $0x8] sm:$0xff]  }
  0x1e   :  { %162 = vmatprep.subr.bf16.mxu0 %v253_v0  ;;  %166 = vmatprep.mubr.msk.bf16.mxu0 %vm254_vm1, %v253_v0  ;;  %49 = vst.msk [vmem:[#allocation2] sm:$0xff] %vm48_vm0, %v253_v0  ;;  %50 = vst.msk [vmem:[#allocation2 + $0x8] sm:$0xff] %vm48_vm0, %v253_v0  ;;  %v180_v2 = vld [vmem:[#allocation6] sm:$0xff]   ;;  %v53_v3 = vld [vmem:[#allocation3] sm:$0xff]  ;;  %s255_s26 = smov [#allocation8]  }
  0x1f   :  { %163 = vmatpush3.bf16.msra.mxu0 %v179_v1  ;;  %v54_v4 = vld [vmem:[#allocation3 + $0x8] sm:$0xff]  ;;  %v158_v14 = vld [vmem:[%s303_s2] ss:$0 sm:$0xff]  ;;  %s142_s27 = sshll.u32 %s255_s26, 4  ;;  %s143_s27 = int_to_ptr.vmem [resolvable:$true] %s142_s27 }
  0x20   :  { %164 = vmatprep.subr.bf16.mxu0 %v253_v0  ;;  %v55_v5 = vpack.c.bf16 %v54_v4, %v53_v3  ;;  %s221_s28 = scalar_lea.vmem %s143_s27, 256  ;;  %p226_p11 = scmp.lt.s32.totalorder %s143_s27, %s143_s27 }
  0x21   :  { %p222_p10 = scmp.ne.s32.totalorder %s143_s27, %s221_s28  ;;  %p227_p12 = scmp.lt.s32.totalorder %s221_s28, %s221_s28 }
  0x23   :  { %165 = vmatpush3.bf16.msra.mxu0 %v180_v2  ;;  %p228_p13 = por %p227_p12, %p226_p11 }
  0x25   :  { %v51_v6 = vld [vmem:[#allocation2] sm:$0xff]  ;;  %v52_v10 = vld [vmem:[#allocation2 + $0x8] sm:$0xff]  ;;  %p229_p0 = pnand %p228_p13, %p222_p10 }
  0x26   :  { %167 = vmatmul.mubr.msk.bf16.vlgmr.msra.gmra.mxu0 %vm48_vm0, %v55_v5 }
  0xe6   :  { %v110_v7 = vpop.f32.mrf.mxu0 }
  0xe7   :  { %v117_v8 = vadd.f32 %v110_v7, %v51_v6 }
  0xe8   :  { %v168_v9 = vpop.f32.mrf.mxu0 }
  0xe9   :  { %119 = vst.msk [vmem:[#allocation2] sm:$0xff] %vm48_vm0, %v117_v8 }
  0xea   :  { %v113_v11 = vpop.f32.mrf.mxu0 }
  0xeb   :  { %v118_v12 = vadd.f32 %v113_v11, %v52_v10 }
  0xec   :  { %v169_v13 = vpop.f32.mrf.mxu0 }
  0xed   :  { %120 = vst.msk [vmem:[#allocation2 + $0x8] sm:$0xff] %vm48_vm0, %v118_v12 }
  0xf0   :  { %v124_v15 = vld [vmem:[#allocation2] sm:$0xff] }
  0xf1   :  { %v133_v16 = vadd.f32 %v158_v14, %v124_v15 }
  0xf3   :  { %135 = vst.msk [vmem:[#allocation8] sm:$0xff] %vm48_vm0, %v133_v16 }
  0xf4   :  { %v125_v17 = vld [vmem:[#allocation2 + $0x8] sm:$0xff] }
  0xf5   :  { %v134_v18 = vadd.f32 %v158_v14, %v125_v17 }
  0xf7   :  { %136 = vst.msk [vmem:[#allocation8 + $0x8] sm:$0xff] %vm48_vm0, %v134_v18 }
  0xf8   :  { %232 = shalt.err (!%p229_p0)
}
  0xf9   :  { %148 = dma.vmem_to_hbm [thread:$0]  %s143_s27, 256, %s304_s3, [#allocation5], %s248_s15, %s248_s15, %s249_s16  }
  0xfa   :  { %245 = dma.done.wait [#allocation5], 256  }
  0xfb   :  { %246 = vsyncadd [#allocation5], 4294967040 }
  0xfc   :  { %152 = vsyncpa [#allocation4], 1 }
  0xfd   :  { %153 = vsyncpa [#allocation7], 1 }
  0xfe   :  { %154 = vsyncpa [#allocation5], 1 }

</bundles_post_ra>
